<compile_context>
chip_gen: v7x
topology: tpu7x:2x2x1
jax: 0.10.0
libtpu: 0.0.40
codegen_flags: <defaults>
</compile_context>

<pallas_src>
import jax
import jax.numpy as jnp
from jax.experimental import pallas as pl
from jax.experimental.pallas import tpu as pltpu


def _round_up(x, m):
    return ((x + m - 1) // m) * m


def sharednet_kernel(x_ref, w1_ref, b1_ref, w2t_ref, b2_ref, out_ref):
    # Layer 1 (MXU): (TB, D) bf16 @ (D, H) bf16 -> f32 accumulation.
    h = jnp.dot(x_ref[...], w1_ref[...], preferred_element_type=jnp.float32)
    # Epilogue in f32 on the VPU.
    h = jnp.maximum(h + b1_ref[...], 0.0)
    # Layer 2 (VPU + lane reduce): two dot-products against rows of w2^T.
    # w2t_ref is (2, H); broadcast each row across sublanes, reduce over lanes.
    c0 = jnp.sum(h * w2t_ref[0:1, :], axis=-1, keepdims=True)  # (TB, 1)
    c1 = jnp.sum(h * w2t_ref[1:2, :], axis=-1, keepdims=True)  # (TB, 1)
    pred = jnp.concatenate([c0, c1], axis=-1) + b2_ref[...]    # (TB, 2)
    out_ref[...] = pred


def sharednet_forward(x, w1, b1, w2, b2, *, tb=512):
    """Returns (m_x, l_x), each of shape (batch,) — mirrors pred.squeeze()[:, i]."""
    B, D = x.shape
    H = w1.shape[1]

    # Batch tile: multiple of 8 (sublane), capped at `tb` rows.
    TB = min(_round_up(B, 8), _round_up(tb, 8))
    B_pad = _round_up(B, TB)

    # bf16 operands for the MXU; pad batch to a whole number of tiles.
    x_bf = x.astype(jnp.bfloat16)
    if B_pad != B:
        x_bf = jnp.pad(x_bf, ((0, B_pad - B), (0, 0)))
    w1_bf = w1.astype(jnp.bfloat16)
    w2t = w2.T.astype(jnp.float32)  # (2, H) — layer 2 runs on the VPU in f32.
    b1_f = b1.astype(jnp.float32)
    b2_f = b2.astype(jnp.float32)

    grid = (B_pad // TB,)

    pred = pl.pallas_call(
        sharednet_kernel,
        out_shape=jax.ShapeDtypeStruct((B_pad, 2), jnp.float32),
        grid_spec=pltpu.PrefetchScalarGridSpec(
            num_scalar_prefetch=0,
            grid=grid,
            in_specs=[
                pl.BlockSpec((TB, D), lambda i: (i, 0)),   # x: tiled over batch
                pl.BlockSpec((D, H), lambda i: (0, 0)),    # w1: resident
                pl.BlockSpec((1, H), lambda i: (0, 0)),    # b1: resident
                pl.BlockSpec((2, H), lambda i: (0, 0)),    # w2^T: resident
                pl.BlockSpec((1, 2), lambda i: (0, 0)),    # b2: resident
            ],
            out_specs=pl.BlockSpec((TB, 2), lambda i: (i, 0)),
        ),
        compiler_params=pltpu.CompilerParams(
            dimension_semantics=("parallel",),
        ),
    )(x_bf, w1_bf, b1_f, w2t, b2_f)

    pred = pred[:B]
    # squeeze() in the PyTorch forward: (B, 2) -> per-column (B,)
    return pred[:, 0], pred[:, 1]


def init_params(key, in_features, hidden):
    """Deterministic parameter init (synthetic; matches Linear(D,H) / Linear(H,2) shapes)."""
    k1, k2, k3, k4 = jax.random.split(key, 4)
    w1 = jax.random.normal(k1, (in_features, hidden), jnp.float32) * 0.1
    b1 = jax.random.normal(k2, (1, hidden), jnp.float32) * 0.1
    w2 = jax.random.normal(k3, (hidden, 2), jnp.float32) * 0.1
    b2 = jax.random.normal(k4, (1, 2), jnp.float32) * 0.1
    return w1, b1, w2, b2


if __name__ == "__main__":
    key = jax.random.PRNGKey(0)
    kx, kp = jax.random.split(key)

    batch, in_features, hidden = 8, 16, 32
    x = jax.random.normal(kx, (batch, in_features), jnp.float32)
    w1, b1, w2, b2 = init_params(kp, in_features, hidden)

    m_x, l_x = sharednet_forward(x, w1, b1, w2, b2)
    jax.block_until_ready((m_x, l_x))

    # Reference check in plain JAX (f32 reference; kernel uses bf16 MXU
    # operands for layer 1, so compare with a bf16-level tolerance).
    h_ref = jnp.maximum(x @ w1 + b1, 0.0)
    pred_ref = h_ref @ w2 + b2
    assert m_x.shape == (batch,) and l_x.shape == (batch,)
    assert jnp.allclose(m_x, pred_ref[:, 0], atol=1e-2, rtol=1e-2)
    assert jnp.allclose(l_x, pred_ref[:, 1], atol=1e-2, rtol=1e-2)

    print("KERNEL_OK")
</pallas_src>

<mosaic_0001>
module attributes {stable_mosaic.version = 11 : i64} {
  func.func @sharednet_kernel(%arg0: i32, %arg1: memref<8x16xbf16, #tpu.memory_space<vmem>>, %arg2: memref<16x32xbf16, #tpu.memory_space<vmem>>, %arg3: memref<1x32xf32, #tpu.memory_space<vmem>>, %arg4: memref<2x32xf32, #tpu.memory_space<vmem>>, %arg5: memref<1x2xf32, #tpu.memory_space<vmem>>, %arg6: memref<8x2xf32, #tpu.memory_space<vmem>>) attributes {dimension_semantics = [#tpu.dimension_semantics<parallel>], iteration_bounds = array<i64: 1>, scalar_prefetch = 0 : i64, scratch_operands = 0 : i64, tpu.core_type = #tpu.core_type<tc>, window_params = [{transform_indices = @transform_0, window_bounds = array<i64: 8, 16>}, {pipeline_mode = #tpu.pipeline_mode<synchronous>, transform_indices = @transform_1, window_bounds = array<i64: 16, 32>}, {pipeline_mode = #tpu.pipeline_mode<synchronous>, transform_indices = @transform_2, window_bounds = array<i64: 1, 32>}, {pipeline_mode = #tpu.pipeline_mode<synchronous>, transform_indices = @transform_3, window_bounds = array<i64: 2, 32>}, {pipeline_mode = #tpu.pipeline_mode<synchronous>, transform_indices = @transform_4, window_bounds = array<i64: 1, 2>}, {transform_indices = @transform_5, window_bounds = array<i64: 8, 2>}]} {
    %c0 = arith.constant 0 : index
    %c0_0 = arith.constant 0 : index
    %0 = vector.load %arg1[%c0, %c0_0] : memref<8x16xbf16, #tpu.memory_space<vmem>>, vector<8x16xbf16>
    %c0_1 = arith.constant 0 : index
    %c0_2 = arith.constant 0 : index
    %1 = vector.load %arg2[%c0_1, %c0_2] : memref<16x32xbf16, #tpu.memory_space<vmem>>, vector<16x32xbf16>
    %cst = arith.constant dense<0.000000e+00> : vector<8x32xf32>
    %2 = tpu.matmul %0, %1, %cst {dimension_numbers = #tpu.dot_dimension_numbers<[1], [0], [0], [1], [0, 0, 1, 1], [], []>} : vector<8x16xbf16>, vector<16x32xbf16>, vector<8x32xf32> -> vector<8x32xf32>
    %c0_3 = arith.constant 0 : index
    %c0_4 = arith.constant 0 : index
    %3 = vector.load %arg3[%c0_3, %c0_4] : memref<1x32xf32, #tpu.memory_space<vmem>>, vector<1x32xf32>
    %4 = vector.broadcast %3 : vector<1x32xf32> to vector<8x32xf32>
    %5 = arith.addf %2, %4 : vector<8x32xf32>
    %cst_5 = arith.constant 0.000000e+00 : f32
    %6 = vector.broadcast %cst_5 : f32 to vector<8x32xf32>
    %7 = arith.maximumf %5, %6 : vector<8x32xf32>
    %c0_6 = arith.constant 0 : index
    %c0_7 = arith.constant 0 : index
    %8 = vector.load %arg4[%c0_6, %c0_7] : memref<2x32xf32, #tpu.memory_space<vmem>>, vector<1x32xf32>
    %9 = vector.broadcast %8 : vector<1x32xf32> to vector<8x32xf32>
    %10 = arith.mulf %7, %9 : vector<8x32xf32>
    %cst_8 = arith.constant dense<0.000000e+00> : vector<8xf32>
    %11 = vector.multi_reduction <add>, %10, %cst_8 [1] : vector<8x32xf32> to vector<8xf32>
    %12 = vector.shape_cast %11 : vector<8xf32> to vector<8x1xf32>
    %c1 = arith.constant 1 : index
    %c0_9 = arith.constant 0 : index
    %13 = vector.load %arg4[%c1, %c0_9] : memref<2x32xf32, #tpu.memory_space<vmem>>, vector<1x32xf32>
    %14 = vector.broadcast %13 : vector<1x32xf32> to vector<8x32xf32>
    %15 = arith.mulf %7, %14 : vector<8x32xf32>
    %cst_10 = arith.constant dense<0.000000e+00> : vector<8xf32>
    %16 = vector.multi_reduction <add>, %15, %cst_10 [1] : vector<8x32xf32> to vector<8xf32>
    %17 = vector.shape_cast %16 : vector<8xf32> to vector<8x1xf32>
    %18 = tpu.concatenate %12, %17 in 1 : vector<8x1xf32>, vector<8x1xf32> -> vector<8x2xf32>
    %c0_11 = arith.constant 0 : index
    %c0_12 = arith.constant 0 : index
    %19 = vector.load %arg5[%c0_11, %c0_12] : memref<1x2xf32, #tpu.memory_space<vmem>>, vector<1x2xf32>
    %20 = vector.broadcast %19 : vector<1x2xf32> to vector<8x2xf32>
    %21 = arith.addf %18, %20 : vector<8x2xf32>
    %c0_13 = arith.constant 0 : index
    %c0_14 = arith.constant 0 : index
    %22 = vector.load %arg6[%c0_13, %c0_14] : memref<8x2xf32, #tpu.memory_space<vmem>>, vector<8x2xf32>
    tpu.vector_store %arg6[%c0_13, %c0_14], %21 {strides = array<i32>} : memref<8x2xf32, #tpu.memory_space<vmem>>, vector<8x2xf32>,
    return
  }
  func.func @transform_0(%arg0: i32) -> (i32, i32) {
    %c0_i32 = arith.constant 0 : i32
    %c0_i32_0 = arith.constant 0 : i32
    return %arg0, %c0_i32 : i32, i32
  }
  func.func @transform_1(%arg0: i32) -> (i32, i32) {
    %c0_i32 = arith.constant 0 : i32
    %c0_i32_0 = arith.constant 0 : i32
    %c0_i32_1 = arith.constant 0 : i32
    return %c0_i32, %c0_i32_0 : i32, i32
  }
  func.func @transform_2(%arg0: i32) -> (i32, i32) {
    %c0_i32 = arith.constant 0 : i32
    %c0_i32_0 = arith.constant 0 : i32
    %c0_i32_1 = arith.constant 0 : i32
    return %c0_i32, %c0_i32_0 : i32, i32
  }
  func.func @transform_3(%arg0: i32) -> (i32, i32) {
    %c0_i32 = arith.constant 0 : i32
    %c0_i32_0 = arith.constant 0 : i32
    %c0_i32_1 = arith.constant 0 : i32
    return %c0_i32, %c0_i32_0 : i32, i32
  }
  func.func @transform_4(%arg0: i32) -> (i32, i32) {
    %c0_i32 = arith.constant 0 : i32
    %c0_i32_0 = arith.constant 0 : i32
    %c0_i32_1 = arith.constant 0 : i32
    return %c0_i32, %c0_i32_0 : i32, i32
  }
  func.func @transform_5(%arg0: i32) -> (i32, i32) {
    %c0_i32 = arith.constant 0 : i32
    %c0_i32_0 = arith.constant 0 : i32
    return %arg0, %c0_i32 : i32, i32
  }
}

</mosaic_0001>

<bundles_post_ra>
// kernel: tpu_custom_call.1
= control target key start
LH: loop header
LB: loop body
LE: loop exit
PB: predicated region body
PF: predicated region fallthrough
CT: control target
= control target key end

     0   :  { %10 = vsyncpa [#allocation3], 0  ;;  %s296_s0 = inlined_call_operand.hbm [shape: bf16[8,16], index: 0, kind: input, shape index: {}]   ;;  %s297_s1 = inlined_call_operand.hbm [shape: bf16[16,32], index: 1, kind: input, shape index: {}]   ;;  %s298_s2 = inlined_call_operand.vmem [shape: f32[1,32], index: 2, kind: input, shape index: {}]   ;;  %s299_s3 = inlined_call_operand.vmem [shape: f32[2,32], index: 3, kind: input, shape index: {}]   ;;  %s300_s4 = inlined_call_operand.vmem [shape: f32[1,2], index: 4, kind: input, shape index: {}]   ;;  %s301_s5 = inlined_call_operand.vmem [shape: f32[8,2], index: 5, kind: output, shape index: {}]  }
   0x1   :  { %11 = vsyncpa [#allocation5], 0  ;;  %s214_s18 = smov [#allocation2]   ;;  %s215_s20 = smov [#allocation4]  }
   0x2   :  { %s18_s19 = sshll.u32 %s214_s18, 4  ;;  %s27_s21 = sshll.u32 %s215_s20, 4  ;;  %s19_s19 = int_to_ptr.vmem [resolvable:$true] %s18_s19  ;;  %s250_s21 = int_to_ptr.vmem [resolvable:$true] %s27_s21 }
   0x3   :  { %s166_s24 = scalar_lea.hbm %s296_s0, 64 }
   0x4   :  { %p167_p0 = scmp.ne.s32.totalorder %s296_s0, %s166_s24  ;;  %p170_p1 = scmp.lt.u32.totalorder %s166_s24, %s296_s0 }
   0x6   :  { %p172_p2 = pnand %p170_p1, %p167_p0 }
   0x8   :  { %175 = shalt.err (!%p172_p2)
}
   0x9   :  { %s176_s29 = scalar_lea.vmem %s19_s19, 64  ;;  %p181_p4 = scmp.lt.s32.totalorder %s19_s19, %s19_s19 }
   0xa   :  { %p177_p3 = scmp.ne.s32.totalorder %s19_s19, %s176_s29  ;;  %p182_p5 = scmp.lt.s32.totalorder %s176_s29, %s176_s29 }
   0xc   :  { %p183_p6 = por %p182_p5, %p181_p4 }
   0xe   :  { %p184_p7 = pnand %p183_p6, %p177_p3 }
  0x10   :  { %187 = shalt.err (!%p184_p7)
}
  0x11   :  { %21 = dma.hbm_to_vmem [thread:$0]  %s296_s0, 64, %s19_s19, [#allocation3]  }
  0x12   :  { %s188_s9 = scalar_lea.hbm %s297_s1, 128 }
  0x13   :  { %p189_p8 = scmp.ne.s32.totalorder %s297_s1, %s188_s9  ;;  %p192_p9 = scmp.lt.u32.totalorder %s188_s9, %s297_s1 }
  0x15   :  { %p194_p10 = pnand %p192_p9, %p189_p8 }
  0x17   :  { %197 = shalt.err (!%p194_p10)
}
  0x18   :  { %s198_s14 = scalar_lea.vmem %s250_s21, 128  ;;  %p203_p12 = scmp.lt.s32.totalorder %s250_s21, %s250_s21 }
  0x19   :  { %p199_p11 = scmp.ne.s32.totalorder %s250_s21, %s198_s14  ;;  %p204_p13 = scmp.lt.s32.totalorder %s198_s14, %s198_s14 }
  0x1b   :  { %p205_p0 = por %p204_p13, %p203_p12 }
  0x1d   :  { %p206_p1 = pnand %p205_p0, %p199_p11 }
  0x1f   :  { %209 = shalt.err (!%p206_p1)
}
  0x20   :  { %s216_s0 = smov 64   ;;  %s217_s15 = smov 4  }
  0x21   :  { %33 = dma.hbm_to_vmem [thread:$0]  %s297_s1, 128, %s250_s21, [#allocation5], %s216_s0, %s216_s0, %s217_s15  }
  0x22   :  { %210 = dma.done.wait [#allocation3], 64  }
  0x23   :  { %211 = vsyncadd [#allocation3], 4294967232 }
  0x24   :  { %212 = dma.done.wait [#allocation5], 128  }
  0x25   :  { %213 = vsyncadd [#allocation5], 4294967168  ;;  %v218_v0 = vmov 0.0   ;;  %vm219_vm0 = vmmov 0   ;;  %v165_v1 = vld [vmem:[#allocation4] sm:$0xff]   ;;  %vm63_vm1 = vcmask 130048  }
  0x26   :  { %153 = vmatprep.subr.bf16.mxu0 %v218_v0  ;;  %155 = vmatprep.mubr.msk.bf16.mxu0 %vm219_vm0, %v218_v0  ;;  %v47_v2 = vld [vmem:[#allocation2] sm:$0xf]  ;;  %vm114_vm2 = vcmask 261120   ;;  %vm127_vm3 = vcmask 7168   ;;  %vm137_vm4 = vcmask 15360  }
  0x27   :  { %154 = vmatpush3.bf16.msra.mxu0 %v165_v1  ;;  %v145_v3 = vld [vmem:[%s298_s2] ss:$0 sm:$0xff]  ;;  %v149_v11 = vld [vmem:[%s299_s3 + $0x1] ss:$0 sm:$0xff] }
  0x28   :  { %v148_v8 = vld [vmem:[%s299_s3] ss:$0 sm:$0xff] }
  0x29   :  { %v150_v17 = vld [vmem:[%s300_s4] ss:$0 sm:$0xff] }
  0x2a   :  { %156 = vmatmul.mubr.msk.bf16.vlgmr.msra.gmra.mrb[0].mxu0 %vm63_vm1, %v47_v2 }
  0xfd   :  { %v101_v4 = vpop.f32.mrb[0].mxu0 }
  0xfe   :  { %v102_v5 = vadd.f32 %v145_v3, %v101_v4  ;;  %v157_v6 = vpop.f32.mrb[1].mxu0 }
  0xff   :  { %v104_v7 = vpop.f32.mrb[2].mxu0 }
 0x100   :  { %v107_v9 = vmax.f32 %v102_v5, 0.0  ;;  %v158_v10 = vpop.f32.mrb[3].mxu0 }
 0x102   :  { %v113_v12 = vmul.f32 %v148_v8, %v107_v9  ;;  %v123_v14 = vmul.f32 %v149_v11, %v107_v9 }
 0x104   :  { %v115_v13 = vsel %vm114_vm2, %v113_v12, 0.0  ;;  %v124_v15 = vsel %vm114_vm2, %v123_v14, 0.0 }
 0x105   :  { %116 = vadd.xlane.f32.xlu0 %v115_v13 }
 0x109   :  { %125 = vadd.xlane.f32.xlu0 %v124_v15 }
 0x192   :  { %v117_v16 = vpop.xlane.xlu0 %116 }
 0x196   :  { %v126_v18 = vpop.xlane.xlu0 %125 }
 0x197   :  { %v128_v19 = vsel %vm127_vm3, %v117_v16, %v126_v18 }
 0x198   :  { %v136_v20 = vadd.f32 %v150_v17, %v128_v19 }
 0x19a   :  { %138 = vst.msk [vmem:[%s301_s5] sm:$0xff] %vm137_vm4, %v136_v20 }
 0x19b   :  { %143 = vsyncpa [#allocation3], 1 }
 0x19c   :  { %144 = vsyncpa [#allocation5], 1 }

</bundles_post_ra>
